<compile_context>
chip_gen: v7x
topology: tpu7x:2x2x1
jax: 0.10.0
libtpu: 0.0.40
codegen_flags: <defaults>
</compile_context>

<pallas_src>
import functools

import jax
import jax.numpy as jnp
from jax.experimental import pallas as pl
from jax.experimental.pallas import tpu as pltpu

EMB_DIM = 32            # small stand-in for gnn_emb_dim=300
NUM_ATOM_TYPE = 120
NUM_CHIRALITY = 3
NUM_BOND_TYPE = 6       # index 4 reserved for self-loop edges
NUM_BOND_DIR = 3
BN_EPS = 1e-5
ENCODER_LAYER = 3       # module default is 5; -> (ENCODER_LAYER - 1) encoder GIN layers

LANE = 128
D_PAD = ((EMB_DIM + LANE - 1) // LANE) * LANE            # 128-lane aligned feature dim
H_PAD = ((2 * EMB_DIM + LANE - 1) // LANE) * LANE        # 128-lane aligned GIN-MLP hidden dim
EDGE_ROWS = 16                                           # bond-type(6)+bond-dir(3) rows, padded


def _round_up(x, m):
    return ((x + m - 1) // m) * m


def _pick_vmem_limit(required_bytes):
    """Clamp the scoped-VMEM request to the physical capacity of this generation."""
    try:
        phys = int(pltpu.get_tpu_info().vmem_capacity_bytes)
    except Exception:
        phys = 64 * 1024 * 1024      # conservative (v7x per-TensorCore VMEM)
    limit = max(int(required_bytes) + (4 << 20), 32 << 20)
    return int(min(limit, int(phys * 0.9)))


# ------------------------- fused Pallas kernel -------------------------

def _fused_gnn_pool_kernel(a_hbm, h0_hbm, etab_ref, w1_ref, b1_ref, w2_ref, b2_ref,
                           p_ref, inv_ref, out_ref,
                           h_state, a_vmem, copy_sem, *, n_layers, tm, n_pad):
    l = pl.program_id(0)            # GIN layer index      (outer, sequential)
    i = pl.program_id(1)            # node row-tile index  (inner)
    n_tiles = pl.num_programs(1)
    parity = l % 2                  # layer l reads slot parity, writes slot 1 - parity

    # One-time load of the layer-invariant extended adjacency and the initial node features.
    @pl.when(jnp.logical_and(l == 0, i == 0))
    def _():
        a_cp = pltpu.make_async_copy(a_hbm, a_vmem, copy_sem.at[0])
        h_cp = pltpu.make_async_copy(h0_hbm, h_state.at[0], copy_sem.at[1])
        a_cp.start()
        h_cp.start()
        a_cp.wait()
        h_cp.wait()

    # Per-layer edge-embedding rows go into the tail of this layer's READ slot (once per layer),
    # so the edge contribution rides for free inside the single A_ext @ h matmul.
    @pl.when(i == 0)
    def _():
        h_state[parity, pl.ds(n_pad, EDGE_ROWS), :] = etab_ref[0]

    # GIN "add" aggregation for this row tile (self-loops + bond counts baked into A_ext).
    row0 = pl.multiple_of(i * tm, tm)
    agg = jnp.dot(a_vmem[pl.ds(row0, tm), :], h_state[parity],
                  preferred_element_type=jnp.float32)

    # GIN MLP: Linear(D,2D) -> ReLU -> Linear(2D,D); eval BatchNorm folded into w2/b2.
    z = jnp.dot(agg.astype(jnp.bfloat16), w1_ref[0],
                preferred_element_type=jnp.float32) + b1_ref[0]
    z = jnp.maximum(z, 0.0)
    z = jnp.dot(z.astype(jnp.bfloat16), w2_ref[0],
                preferred_element_type=jnp.float32) + b2_ref[0]
    # ReLU on all but the last layer (the tokenizer->encoder gnn_act ReLU is folded here).
    z = jnp.where(l < n_layers - 1, jnp.maximum(z, 0.0), z)

    # Write this row tile of the next layer's input (single dynamic-slot store).
    h_state[1 - parity, pl.ds(row0, tm), :] = z.astype(jnp.bfloat16)

    # Fused global mean pool: one bf16 lane-dense matmul in the final-step epilogue,
    # written straight into the resident output block (f32 1/count scale).
    @pl.when(jnp.logical_and(l == n_layers - 1, i == n_tiles - 1))
    def _():
        h_fin = h_state[n_layers % 2, :n_pad, :]      # final layer output (node rows only)
        out_ref[...] = (jnp.dot(p_ref[...], h_fin, preferred_element_type=jnp.float32)
                        * inv_ref[...])


def fused_gnn_pool(a_ext, h0_ext, P, inv, packed, *, n_layers, tm, n_pad):
    nk = a_ext.shape[1]
    d_pad = h0_ext.shape[1]
    g_pad = P.shape[0]
    n_tiles = n_pad // tm

    # Resident footprint: A scratch + double-buffered h_state + pooling inputs + output,
    # plus double-buffered per-layer weight blocks.
    resident = (n_pad * nk * 2 + 2 * nk * d_pad * 2
                + 2 * g_pad * n_pad * 2 + 2 * g_pad * d_pad * 4 + g_pad * d_pad * 4)
    per_layer = 2 * (EDGE_ROWS * d_pad * 2 + d_pad * H_PAD * 2 + H_PAD * 4
                     + H_PAD * d_pad * 2 + d_pad * 4)
    vmem_limit = _pick_vmem_limit(resident + per_layer)

    kernel = functools.partial(_fused_gnn_pool_kernel,
                               n_layers=n_layers, tm=tm, n_pad=n_pad)
    return pl.pallas_call(
        kernel,
        out_shape=jax.ShapeDtypeStruct((g_pad, d_pad), jnp.float32),
        grid_spec=pltpu.PrefetchScalarGridSpec(
            num_scalar_prefetch=0,
            grid=(n_layers, n_tiles),
            in_specs=[
                pl.BlockSpec(memory_space=pl.ANY),                            # A_ext (HBM, 1 DMA)
                pl.BlockSpec(memory_space=pl.ANY),                            # h0    (HBM, 1 DMA)
                pl.BlockSpec((1, EDGE_ROWS, d_pad), lambda l, i: (l, 0, 0)),  # per-layer edge rows
                pl.BlockSpec((1, d_pad, H_PAD), lambda l, i: (l, 0, 0)),      # w1
                pl.BlockSpec((1, 1, H_PAD), lambda l, i: (l, 0, 0)),          # b1
                pl.BlockSpec((1, H_PAD, d_pad), lambda l, i: (l, 0, 0)),      # w2 (BN folded)
                pl.BlockSpec((1, 1, d_pad), lambda l, i: (l, 0, 0)),          # b2 (BN folded)
                pl.BlockSpec((g_pad, n_pad), lambda l, i: (0, 0)),            # P (resident, 1 DMA)
                pl.BlockSpec((g_pad, d_pad), lambda l, i: (0, 0)),            # 1/count scale
            ],
            out_specs=pl.BlockSpec((g_pad, d_pad), lambda l, i: (0, 0)),
            scratch_shapes=[
                pltpu.VMEM((2, nk, d_pad), jnp.bfloat16),   # double-buffered node+edge features
                pltpu.VMEM((n_pad, nk), jnp.bfloat16),      # resident extended adjacency
                pltpu.SemaphoreType.DMA((2,)),
            ],
        ),
        compiler_params=pltpu.CompilerParams(
            dimension_semantics=("arbitrary", "arbitrary"),
            vmem_limit_bytes=vmem_limit,
        ),
    )(a_ext, h0_ext, packed["etab"], packed["w1"], packed["b1"],
      packed["w2"], packed["b2"], P, inv)


# ------------------------- parameters -------------------------

def init_params(key, emb_dim, n_layers_total):
    ks = jax.random.split(key, 2 + 6 * n_layers_total)
    params = {
        "atom_emb1": 0.1 * jax.random.normal(ks[0], (NUM_ATOM_TYPE, emb_dim), jnp.float32),
        "atom_emb2": 0.1 * jax.random.normal(ks[1], (NUM_CHIRALITY, emb_dim), jnp.float32),
        "layers": [],
    }
    for l in range(n_layers_total):
        b = 2 + 6 * l
        params["layers"].append({
            "edge_emb1": 0.1 * jax.random.normal(ks[b + 0], (NUM_BOND_TYPE, emb_dim), jnp.float32),
            "edge_emb2": 0.1 * jax.random.normal(ks[b + 1], (NUM_BOND_DIR, emb_dim), jnp.float32),
            "w1": (1.0 / jnp.sqrt(emb_dim)) *
                  jax.random.normal(ks[b + 2], (emb_dim, 2 * emb_dim), jnp.float32),
            "b1": 0.01 * jax.random.normal(ks[b + 3], (1, 2 * emb_dim), jnp.float32),
            "w2": (1.0 / jnp.sqrt(2 * emb_dim)) *
                  jax.random.normal(ks[b + 4], (2 * emb_dim, emb_dim), jnp.float32),
            "b2": 0.01 * jax.random.normal(ks[b + 5], (1, emb_dim), jnp.float32),
            "gamma": jnp.ones((1, emb_dim), jnp.float32),     # BatchNorm affine
            "beta": jnp.zeros((1, emb_dim), jnp.float32),
            "bn_mean": jnp.zeros((1, emb_dim), jnp.float32),  # running stats (eval)
            "bn_var": jnp.ones((1, emb_dim), jnp.float32),
        })
    return params


def pack_params(params):
    """Pad to 128-lane shapes, fold eval BatchNorm into linear2, stack per-layer, cast to bf16."""
    etab, w1s, b1s, w2s, b2s = [], [], [], [], []
    for lp in params["layers"]:
        e = jnp.zeros((EDGE_ROWS, D_PAD), jnp.float32)
        e = e.at[:NUM_BOND_TYPE, :EMB_DIM].set(lp["edge_emb1"])
        e = e.at[NUM_BOND_TYPE:NUM_BOND_TYPE + NUM_BOND_DIR, :EMB_DIM].set(lp["edge_emb2"])
        etab.append(e)

        w1 = jnp.zeros((D_PAD, H_PAD), jnp.float32).at[:EMB_DIM, :2 * EMB_DIM].set(lp["w1"])
        b1 = jnp.zeros((1, H_PAD), jnp.float32).at[:, :2 * EMB_DIM].set(lp["b1"])

        # BatchNorm1d (eval): y = (z - mean) * gamma / sqrt(var + eps) + beta, folded into linear2.
        scale = lp["gamma"] / jnp.sqrt(lp["bn_var"] + BN_EPS)            # (1, D)
        w2_eff = lp["w2"] * scale
        b2_eff = (lp["b2"] - lp["bn_mean"]) * scale + lp["beta"]
        w2 = jnp.zeros((H_PAD, D_PAD), jnp.float32).at[:2 * EMB_DIM, :EMB_DIM].set(w2_eff)
        b2 = jnp.zeros((1, D_PAD), jnp.float32).at[:, :EMB_DIM].set(b2_eff)

        w1s.append(w1); b1s.append(b1); w2s.append(w2); b2s.append(b2)

    return {
        "etab": jnp.stack(etab).astype(jnp.bfloat16),   # (L, 16, D_PAD)
        "w1": jnp.stack(w1s).astype(jnp.bfloat16),      # (L, D_PAD, H_PAD)
        "b1": jnp.stack(b1s),                           # (L, 1, H_PAD) f32
        "w2": jnp.stack(w2s).astype(jnp.bfloat16),      # (L, H_PAD, D_PAD)
        "b2": jnp.stack(b2s),                           # (L, 1, D_PAD) f32
    }


# ------------------------- forward (index glue + fused kernel call) -------------------------

def token_mae_clf_forward(params, x, edge_index, edge_attr, batch, num_graphs):
    N = int(x.shape[0])
    n_layers = len(params["layers"])

    # add self-loops with edge_attr [4, 0] (pretrain-gnns convention)
    self_idx = jnp.arange(N, dtype=jnp.int32)
    ei = jnp.concatenate([edge_index, jnp.stack([self_idx, self_idx])], axis=1)
    ea = jnp.concatenate(
        [edge_attr,
         jnp.stack([jnp.full((N,), 4, jnp.int32), jnp.zeros((N,), jnp.int32)], axis=1)],
        axis=0)
    src, dst = ei[0], ei[1]

    # tiling geometry: row tile >= 128; a single tile per layer for small batches
    if N <= 256:
        n_pad = _round_up(max(N, 1), 128)
        tm = n_pad
    else:
        tm = 256
        n_pad = _round_up(N, tm)
    nk = n_pad + EDGE_ROWS
    g_pad = _round_up(num_graphs, 8)

    # Extended adjacency A_ext = [A | bond-type / bond-dir counts], built directly in bf16
    # (0/1/small integer counts are exact). Padded node rows/cols stay zero.
    a_ext = jnp.zeros((n_pad, nk), jnp.bfloat16)
    a_ext = a_ext.at[dst, src].add(1.0)
    a_ext = a_ext.at[dst, n_pad + ea[:, 0]].add(1.0)
    a_ext = a_ext.at[dst, n_pad + NUM_BOND_TYPE + ea[:, 1]].add(1.0)

    # tokenizer atom embedding lookup; edge-table tail rows + padding left zero
    # (overwritten in-kernel each layer with that layer's edge embeddings).
    h0 = params["atom_emb1"][x[:, 0]] + params["atom_emb2"][x[:, 1]]
    h0_ext = jnp.zeros((nk, D_PAD), jnp.float32).at[:N, :EMB_DIM].set(h0).astype(jnp.bfloat16)

    # pe_type='none' -> pe_tokens is None (nothing to concatenate)

    # mean pool: exact 0/1 bf16 membership matrix + f32 1/count epilogue scale
    counts = jnp.zeros((num_graphs,), jnp.float32).at[batch].add(1.0)
    P = jnp.zeros((g_pad, n_pad), jnp.bfloat16).at[batch, jnp.arange(N)].set(1.0)
    inv = jnp.zeros((g_pad,), jnp.float32).at[:num_graphs].set(1.0 / jnp.maximum(counts, 1.0))
    inv = jnp.broadcast_to(inv[:, None], (g_pad, D_PAD))

    packed = pack_params(params)

    out = fused_gnn_pool(a_ext, h0_ext, P, inv, packed,
                         n_layers=n_layers, tm=tm, n_pad=n_pad)
    graph_rep = out[:num_graphs, :EMB_DIM]
    return graph_rep, graph_rep


# ------------------------- pure-JAX f32 reference -------------------------

def forward_reference(params, x, edge_index, edge_attr, batch, num_graphs):
    N = x.shape[0]
    self_idx = jnp.arange(N, dtype=jnp.int32)
    ei = jnp.concatenate([edge_index, jnp.stack([self_idx, self_idx])], axis=1)
    ea = jnp.concatenate(
        [edge_attr,
         jnp.stack([jnp.full((N,), 4, jnp.int32), jnp.zeros((N,), jnp.int32)], axis=1)],
        axis=0)
    src, dst = ei[0], ei[1]

    h = params["atom_emb1"][x[:, 0]] + params["atom_emb2"][x[:, 1]]
    n_layers = len(params["layers"])
    for l, lp in enumerate(params["layers"]):
        eemb = lp["edge_emb1"][ea[:, 0]] + lp["edge_emb2"][ea[:, 1]]
        agg = jnp.zeros_like(h).at[dst].add(h[src] + eemb)
        z = jnp.maximum(agg @ lp["w1"] + lp["b1"], 0.0) @ lp["w2"] + lp["b2"]
        z = (z - lp["bn_mean"]) * lp["gamma"] / jnp.sqrt(lp["bn_var"] + BN_EPS) + lp["beta"]
        h = jnp.maximum(z, 0.0) if l < n_layers - 1 else z
    counts = jnp.zeros((num_graphs,), jnp.float32).at[batch].add(1.0)
    pooled = jnp.zeros((num_graphs, h.shape[1]), jnp.float32).at[batch].add(h)
    return pooled / jnp.maximum(counts, 1.0)[:, None]


# ------------------------- demo -------------------------

if __name__ == "__main__":
    key = jax.random.PRNGKey(0)
    k_x1, k_x2, k_ea1, k_ea2, k_p = jax.random.split(key, 5)

    num_graphs = 2
    nodes_per_graph = 8
    N = num_graphs * nodes_per_graph

    # data.x : (N, 2) integer atom features
    x = jnp.stack([
        jax.random.randint(k_x1, (N,), 0, NUM_ATOM_TYPE, dtype=jnp.int32),
        jax.random.randint(k_x2, (N,), 0, NUM_CHIRALITY, dtype=jnp.int32),
    ], axis=1)

    # bidirectional chain inside each graph
    srcs, dsts = [], []
    for g in range(num_graphs):
        off = g * nodes_per_graph
        for i in range(nodes_per_graph - 1):
            srcs += [off + i, off + i + 1]
            dsts += [off + i + 1, off + i]
    edge_index = jnp.array([srcs, dsts], dtype=jnp.int32)          # (2, E)
    E = edge_index.shape[1]

    # data.edge_attr : (E, 2) integer bond features (bond type < 4, direction < 3)
    edge_attr = jnp.stack([
        jax.random.randint(k_ea1, (E,), 0, 4, dtype=jnp.int32),
        jax.random.randint(k_ea2, (E,), 0, NUM_BOND_DIR, dtype=jnp.int32),
    ], axis=1)

    # data.batch : graph id per node
    batch = jnp.repeat(jnp.arange(num_graphs, dtype=jnp.int32), nodes_per_graph)

    params = init_params(k_p, EMB_DIM, 1 + (ENCODER_LAYER - 1))

    graph_rep, graph_rep2 = token_mae_clf_forward(
        params, x, edge_index, edge_attr, batch, num_graphs)
    jax.block_until_ready((graph_rep, graph_rep2))

    assert graph_rep.shape == (num_graphs, EMB_DIM)
    assert bool(jnp.array_equal(graph_rep, graph_rep2))
    assert bool(jnp.all(jnp.isfinite(graph_rep)))

    # tolerance check against the pure-JAX f32 reference (kernel uses bf16 MXU operands)
    ref = forward_reference(params, x, edge_index, edge_attr, batch, num_graphs)
    err = float(jnp.max(jnp.abs(graph_rep - ref)))
    tol = 5e-2 * (1.0 + float(jnp.max(jnp.abs(ref))))
    assert err <= tol, f"max abs err {err} > tol {tol}"

    print("KERNEL_OK")
</pallas_src>

<mosaic_0001>
module attributes {stable_mosaic.version = 11 : i64} {
  func.func @_fused_gnn_pool_kernel(%arg0: i32, %arg1: i32, %arg2: memref<128x144xbf16, #tpu.memory_space<any>>, %arg3: memref<144x128xbf16, #tpu.memory_space<any>>, %arg4: memref<1x16x128xbf16, #tpu.memory_space<vmem>>, %arg5: memref<1x128x128xbf16, #tpu.memory_space<vmem>>, %arg6: memref<1x1x128xf32, #tpu.memory_space<vmem>>, %arg7: memref<1x128x128xbf16, #tpu.memory_space<vmem>>, %arg8: memref<1x1x128xf32, #tpu.memory_space<vmem>>, %arg9: memref<8x128xbf16, #tpu.memory_space<vmem>>, %arg10: memref<8x128xf32, #tpu.memory_space<vmem>>, %arg11: memref<8x128xf32, #tpu.memory_space<vmem>>, %arg12: memref<2x144x128xbf16, #tpu.memory_space<vmem>>, %arg13: memref<128x144xbf16, #tpu.memory_space<vmem>>, %arg14: memref<2x!tpu.dma_semaphore, #tpu.memory_space<semaphore_mem>>) attributes {dimension_semantics = [#tpu.dimension_semantics<arbitrary>, #tpu.dimension_semantics<arbitrary>], iteration_bounds = array<i64: 3, 1>, scalar_prefetch = 0 : i64, scratch_operands = 3 : i64, tpu.core_type = #tpu.core_type<tc>, window_params = [{}, {}, {transform_indices = @transform_2, window_bounds = array<i64: 1, 16, 128>}, {transform_indices = @transform_3, window_bounds = array<i64: 1, 128, 128>}, {transform_indices = @transform_4, window_bounds = array<i64: 1, 1, 128>}, {transform_indices = @transform_5, window_bounds = array<i64: 1, 128, 128>}, {transform_indices = @transform_6, window_bounds = array<i64: 1, 1, 128>}, {pipeline_mode = #tpu.pipeline_mode<synchronous>, transform_indices = @transform_7, window_bounds = array<i64: 8, 128>}, {pipeline_mode = #tpu.pipeline_mode<synchronous>, transform_indices = @transform_8, window_bounds = array<i64: 8, 128>}, {pipeline_mode = #tpu.pipeline_mode<synchronous>, transform_indices = @transform_9, window_bounds = array<i64: 8, 128>}]} {
    %c2_i32 = arith.constant 2 : i32
    %c0_i32 = arith.constant 0 : i32
    %0 = arith.cmpi eq, %c2_i32, %c0_i32 : i32
    %c1_i32 = arith.constant 1 : i32
    %1 = arith.select %0, %c1_i32, %c2_i32 : i32
    %2 = arith.remsi %arg0, %1 : i32
    %c0_i32_0 = arith.constant 0 : i32
    %3 = arith.cmpi ne, %2, %c0_i32_0 : i32
    %c0_i32_1 = arith.constant 0 : i32
    %4 = arith.cmpi slt, %2, %c0_i32_1 : i32
    %c0_i32_2 = arith.constant 0 : i32
    %5 = arith.cmpi slt, %1, %c0_i32_2 : i32
    %6 = arith.xori %4, %5 : i1
    %7 = arith.andi %6, %3 : i1
    %8 = arith.addi %2, %1 : i32
    %9 = arith.select %7, %8, %2 : i32
    %c0_i32_3 = arith.constant 0 : i32
    %10 = arith.cmpi eq, %arg0, %c0_i32_3 : i32
    %c0_i32_4 = arith.constant 0 : i32
    %11 = arith.cmpi eq, %arg1, %c0_i32_4 : i32
    %12 = arith.andi %10, %11 : i1
    %13 = arith.extui %12 : i1 to i32
    %c0_i32_5 = arith.constant 0 : i32
    %14 = arith.cmpi ne, %13, %c0_i32_5 : i32
    scf.if %14 {
      %c0_i32_32 = arith.constant 0 : i32
      %60 = tpu.memref_slice %arg14[%c0_i32_32] : memref<2x!tpu.dma_semaphore, #tpu.memory_space<semaphore_mem>> -> memref<1x!tpu.dma_semaphore, #tpu.memory_space<semaphore_mem>>
      %61 = tpu.memref_squeeze %60 : memref<1x!tpu.dma_semaphore, #tpu.memory_space<semaphore_mem>> -> memref<!tpu.dma_semaphore, #tpu.memory_space<semaphore_mem>>
      tpu.enqueue_dma source(%arg2 : memref<128x144xbf16, #tpu.memory_space<any>>) target(%arg13 : memref<128x144xbf16, #tpu.memory_space<vmem>>) target_semaphore(%61 : memref<!tpu.dma_semaphore, #tpu.memory_space<semaphore_mem>>)
      %c0_i32_33 = arith.constant 0 : i32
      %c1_i32_34 = arith.constant 1 : i32
      %c0_i32_35 = arith.constant 0 : i32
      %c0_i32_36 = arith.constant 0 : i32
      %62 = tpu.memref_slice %arg12[%c0_i32_33, %c0_i32_35, %c0_i32_36] : memref<2x144x128xbf16, #tpu.memory_space<vmem>> -> memref<1x144x128xbf16, #tpu.memory_space<vmem>>
      %63 = tpu.memref_squeeze %62 : memref<1x144x128xbf16, #tpu.memory_space<vmem>> -> memref<144x128xbf16, #tpu.memory_space<vmem>>
      %64 = tpu.memref_slice %arg14[%c1_i32_34] : memref<2x!tpu.dma_semaphore, #tpu.memory_space<semaphore_mem>> -> memref<1x!tpu.dma_semaphore, #tpu.memory_space<semaphore_mem>>
      %65 = tpu.memref_squeeze %64 : memref<1x!tpu.dma_semaphore, #tpu.memory_space<semaphore_mem>> -> memref<!tpu.dma_semaphore, #tpu.memory_space<semaphore_mem>>
      tpu.enqueue_dma source(%arg3 : memref<144x128xbf16, #tpu.memory_space<any>>) target(%63 : memref<144x128xbf16, #tpu.memory_space<vmem>>) target_semaphore(%65 : memref<!tpu.dma_semaphore, #tpu.memory_space<semaphore_mem>>)
      %c0_i32_37 = arith.constant 0 : i32
      %66 = tpu.memref_slice %arg14[%c0_i32_37] : memref<2x!tpu.dma_semaphore, #tpu.memory_space<semaphore_mem>> -> memref<1x!tpu.dma_semaphore, #tpu.memory_space<semaphore_mem>>
      %67 = tpu.memref_squeeze %66 : memref<1x!tpu.dma_semaphore, #tpu.memory_space<semaphore_mem>> -> memref<!tpu.dma_semaphore, #tpu.memory_space<semaphore_mem>>
      tpu.wait_dma2 semaphore(%67 : memref<!tpu.dma_semaphore, #tpu.memory_space<semaphore_mem>>) src(%arg2 : memref<128x144xbf16, #tpu.memory_space<any>>) dst(%arg13 : memref<128x144xbf16, #tpu.memory_space<vmem>>)
      %c0_i32_38 = arith.constant 0 : i32
      %c1_i32_39 = arith.constant 1 : i32
      %c0_i32_40 = arith.constant 0 : i32
      %c0_i32_41 = arith.constant 0 : i32
      %68 = tpu.memref_slice %arg12[%c0_i32_38, %c0_i32_40, %c0_i32_41] : memref<2x144x128xbf16, #tpu.memory_space<vmem>> -> memref<1x144x128xbf16, #tpu.memory_space<vmem>>
      %69 = tpu.memref_squeeze %68 : memref<1x144x128xbf16, #tpu.memory_space<vmem>> -> memref<144x128xbf16, #tpu.memory_space<vmem>>
      %70 = tpu.memref_slice %arg14[%c1_i32_39] : memref<2x!tpu.dma_semaphore, #tpu.memory_space<semaphore_mem>> -> memref<1x!tpu.dma_semaphore, #tpu.memory_space<semaphore_mem>>
      %71 = tpu.memref_squeeze %70 : memref<1x!tpu.dma_semaphore, #tpu.memory_space<semaphore_mem>> -> memref<!tpu.dma_semaphore, #tpu.memory_space<semaphore_mem>>
      tpu.wait_dma2 semaphore(%71 : memref<!tpu.dma_semaphore, #tpu.memory_space<semaphore_mem>>) src(%arg3 : memref<144x128xbf16, #tpu.memory_space<any>>) dst(%69 : memref<144x128xbf16, #tpu.memory_space<vmem>>)
    } else {
    }
    %c0_i32_6 = arith.constant 0 : i32
    %15 = arith.cmpi eq, %arg1, %c0_i32_6 : i32
    %16 = arith.extui %15 : i1 to i32
    %c0_i32_7 = arith.constant 0 : i32
    %17 = arith.cmpi ne, %16, %c0_i32_7 : i32
    scf.if %17 {
      %c0_32 = arith.constant 0 : index
      %c0_33 = arith.constant 0 : index
      %c0_34 = arith.constant 0 : index
      %60 = vector.load %arg4[%c0_32, %c0_33, %c0_34] : memref<1x16x128xbf16, #tpu.memory_space<vmem>>, vector<1x16x128xbf16>
      %61 = vector.shape_cast %60 : vector<1x16x128xbf16> to vector<16x128xbf16>
      %62 = arith.index_cast %9 : i32 to index
      %c128 = arith.constant 128 : index
      %c0_35 = arith.constant 0 : index
      %63 = vector.load %arg12[%62, %c128, %c0_35] : memref<2x144x128xbf16, #tpu.memory_space<vmem>>, vector<1x16x128xbf16>
      %64 = vector.shape_cast %63 : vector<1x16x128xbf16> to vector<16x128xbf16>
      %65 = vector.shape_cast %61 : vector<16x128xbf16> to vector<1x16x128xbf16>
      tpu.vector_store %arg12[%62, %c128, %c0_35], %65 {strides = array<i32>} : memref<2x144x128xbf16, #tpu.memory_space<vmem>>, vector<1x16x128xbf16>,
    } else {
    }
    %c128_i32 = arith.constant 128 : i32
    %18 = arith.muli %arg1, %c128_i32 : i32
    %19 = tpu.assume_multiple %18, 128 : i32
    %20 = arith.index_cast %19 : i32 to index
    %c0 = arith.constant 0 : index
    %21 = vector.load %arg13[%20, %c0] : memref<128x144xbf16, #tpu.memory_space<vmem>>, vector<128x144xbf16>
    %22 = arith.index_cast %9 : i32 to index
    %c0_8 = arith.constant 0 : index
    %c0_9 = arith.constant 0 : index
    %23 = vector.load %arg12[%22, %c0_8, %c0_9] : memref<2x144x128xbf16, #tpu.memory_space<vmem>>, vector<1x144x128xbf16>
    %24 = vector.shape_cast %23 : vector<1x144x128xbf16> to vector<144x128xbf16>
    %cst = arith.constant dense<0.000000e+00> : vector<128x128xf32>
    %25 = tpu.matmul %21, %24, %cst {dimension_numbers = #tpu.dot_dimension_numbers<[1], [0], [0], [1], [0, 0, 1, 1], [], []>} : vector<128x144xbf16>, vector<144x128xbf16>, vector<128x128xf32> -> vector<128x128xf32>
    %26 = arith.truncf %25 : vector<128x128xf32> to vector<128x128xbf16>
    %c0_10 = arith.constant 0 : index
    %c0_11 = arith.constant 0 : index
    %c0_12 = arith.constant 0 : index
    %27 = vector.load %arg5[%c0_10, %c0_11, %c0_12] : memref<1x128x128xbf16, #tpu.memory_space<vmem>>, vector<1x128x128xbf16>
    %28 = vector.shape_cast %27 : vector<1x128x128xbf16> to vector<128x128xbf16>
    %cst_13 = arith.constant dense<0.000000e+00> : vector<128x128xf32>
    %29 = tpu.matmul %26, %28, %cst_13 {dimension_numbers = #tpu.dot_dimension_numbers<[1], [0], [0], [1], [0, 0, 1, 1], [], []>} : vector<128x128xbf16>, vector<128x128xbf16>, vector<128x128xf32> -> vector<128x128xf32>
    %c0_14 = arith.constant 0 : index
    %c0_15 = arith.constant 0 : index
    %c0_16 = arith.constant 0 : index
    %30 = vector.load %arg6[%c0_14, %c0_15, %c0_16] : memref<1x1x128xf32, #tpu.memory_space<vmem>>, vector<1x1x128xf32>
    %31 = vector.shape_cast %30 : vector<1x1x128xf32> to vector<1x128xf32>
    %32 = vector.broadcast %31 : vector<1x128xf32> to vector<128x128xf32>
    %33 = arith.addf %29, %32 : vector<128x128xf32>
    %cst_17 = arith.constant 0.000000e+00 : f32
    %34 = vector.broadcast %cst_17 : f32 to vector<128x128xf32>
    %35 = arith.maximumf %33, %34 : vector<128x128xf32>
    %36 = arith.truncf %35 : vector<128x128xf32> to vector<128x128xbf16>
    %c0_18 = arith.constant 0 : index
    %c0_19 = arith.constant 0 : index
    %c0_20 = arith.constant 0 : index
    %37 = vector.load %arg7[%c0_18, %c0_19, %c0_20] : memref<1x128x128xbf16, #tpu.memory_space<vmem>>, vector<1x128x128xbf16>
    %38 = vector.shape_cast %37 : vector<1x128x128xbf16> to vector<128x128xbf16>
    %cst_21 = arith.constant dense<0.000000e+00> : vector<128x128xf32>
    %39 = tpu.matmul %36, %38, %cst_21 {dimension_numbers = #tpu.dot_dimension_numbers<[1], [0], [0], [1], [0, 0, 1, 1], [], []>} : vector<128x128xbf16>, vector<128x128xbf16>, vector<128x128xf32> -> vector<128x128xf32>
    %c0_22 = arith.constant 0 : index
    %c0_23 = arith.constant 0 : index
    %c0_24 = arith.constant 0 : index
    %40 = vector.load %arg8[%c0_22, %c0_23, %c0_24] : memref<1x1x128xf32, #tpu.memory_space<vmem>>, vector<1x1x128xf32>
    %41 = vector.shape_cast %40 : vector<1x1x128xf32> to vector<1x128xf32>
    %42 = vector.broadcast %41 : vector<1x128xf32> to vector<128x128xf32>
    %43 = arith.addf %39, %42 : vector<128x128xf32>
    %c2_i32_25 = arith.constant 2 : i32
    %44 = arith.cmpi slt, %arg0, %c2_i32_25 : i32
    %cst_26 = arith.constant 0.000000e+00 : f32
    %45 = vector.broadcast %cst_26 : f32 to vector<128x128xf32>
    %46 = arith.maximumf %43, %45 : vector<128x128xf32>
    %47 = arith.select %44, %46, %43 : vector<128x128xf32>
    %48 = arith.truncf %47 : vector<128x128xf32> to vector<128x128xbf16>
    %c1_i32_27 = arith.constant 1 : i32
    %49 = arith.subi %c1_i32_27, %9 : i32
    %50 = arith.index_cast %49 : i32 to index
    %51 = arith.index_cast %19 : i32 to index
    %c0_28 = arith.constant 0 : index
    %52 = vector.load %arg12[%50, %51, %c0_28] : memref<2x144x128xbf16, #tpu.memory_space<vmem>>, vector<1x128x128xbf16>
    %53 = vector.shape_cast %52 : vector<1x128x128xbf16> to vector<128x128xbf16>
    %54 = vector.shape_cast %48 : vector<128x128xbf16> to vector<1x128x128xbf16>
    tpu.vector_store %arg12[%50, %51, %c0_28], %54 {strides = array<i32>} : memref<2x144x128xbf16, #tpu.memory_space<vmem>>, vector<1x128x128xbf16>,
    %c2_i32_29 = arith.constant 2 : i32
    %55 = arith.cmpi eq, %arg0, %c2_i32_29 : i32
    %c0_i32_30 = arith.constant 0 : i32
    %56 = arith.cmpi eq, %arg1, %c0_i32_30 : i32
    %57 = arith.andi %55, %56 : i1
    %58 = arith.extui %57 : i1 to i32
    %c0_i32_31 = arith.constant 0 : i32
    %59 = arith.cmpi ne, %58, %c0_i32_31 : i32
    scf.if %59 {
      %c1 = arith.constant 1 : index
      %c0_32 = arith.constant 0 : index
      %c0_33 = arith.constant 0 : index
      %60 = vector.load %arg12[%c1, %c0_32, %c0_33] : memref<2x144x128xbf16, #tpu.memory_space<vmem>>, vector<1x128x128xbf16>
      %61 = vector.shape_cast %60 : vector<1x128x128xbf16> to vector<128x128xbf16>
      %c0_34 = arith.constant 0 : index
      %c0_35 = arith.constant 0 : index
      %62 = vector.load %arg9[%c0_34, %c0_35] : memref<8x128xbf16, #tpu.memory_space<vmem>>, vector<8x128xbf16>
      %cst_36 = arith.constant dense<0.000000e+00> : vector<8x128xf32>
      %63 = tpu.matmul %62, %61, %cst_36 {dimension_numbers = #tpu.dot_dimension_numbers<[1], [0], [0], [1], [0, 0, 1, 1], [], []>} : vector<8x128xbf16>, vector<128x128xbf16>, vector<8x128xf32> -> vector<8x128xf32>
      %c0_37 = arith.constant 0 : index
      %c0_38 = arith.constant 0 : index
      %64 = vector.load %arg10[%c0_37, %c0_38] : memref<8x128xf32, #tpu.memory_space<vmem>>, vector<8x128xf32>
      %65 = arith.mulf %63, %64 : vector<8x128xf32>
      %c0_39 = arith.constant 0 : index
      %c0_40 = arith.constant 0 : index
      %66 = vector.load %arg11[%c0_39, %c0_40] : memref<8x128xf32, #tpu.memory_space<vmem>>, vector<8x128xf32>
      tpu.vector_store %arg11[%c0_39, %c0_40], %65 {strides = array<i32>} : memref<8x128xf32, #tpu.memory_space<vmem>>, vector<8x128xf32>,
    } else {
    }
    return
  }
  func.func @transform_2(%arg0: i32, %arg1: i32) -> (i32, i32, i32) {
    %c0_i32 = arith.constant 0 : i32
    %c0_i32_0 = arith.constant 0 : i32
    %c0_i32_1 = arith.constant 0 : i32
    return %arg0, %c0_i32, %c0_i32_0 : i32, i32, i32
  }
  func.func @transform_3(%arg0: i32, %arg1: i32) -> (i32, i32, i32) {
    %c0_i32 = arith.constant 0 : i32
    %c0_i32_0 = arith.constant 0 : i32
    %c0_i32_1 = arith.constant 0 : i32
    return %arg0, %c0_i32, %c0_i32_0 : i32, i32, i32
  }
  func.func @transform_4(%arg0: i32, %arg1: i32) -> (i32, i32, i32) {
    %c0_i32 = arith.constant 0 : i32
    %c0_i32_0 = arith.constant 0 : i32
    %c0_i32_1 = arith.constant 0 : i32
    return %arg0, %c0_i32, %c0_i32_0 : i32, i32, i32
  }
  func.func @transform_5(%arg0: i32, %arg1: i32) -> (i32, i32, i32) {
    %c0_i32 = arith.constant 0 : i32
    %c0_i32_0 = arith.constant 0 : i32
    %c0_i32_1 = arith.constant 0 : i32
    return %arg0, %c0_i32, %c0_i32_0 : i32, i32, i32
  }
  func.func @transform_6(%arg0: i32, %arg1: i32) -> (i32, i32, i32) {
    %c0_i32 = arith.constant 0 : i32
    %c0_i32_0 = arith.constant 0 : i32
    %c0_i32_1 = arith.constant 0 : i32
    return %arg0, %c0_i32, %c0_i32_0 : i32, i32, i32
  }
  func.func @transform_7(%arg0: i32, %arg1: i32) -> (i32, i32) {
    %c0_i32 = arith.constant 0 : i32
    %c0_i32_0 = arith.constant 0 : i32
    %c0_i32_1 = arith.constant 0 : i32
    return %c0_i32, %c0_i32_0 : i32, i32
  }
  func.func @transform_8(%arg0: i32, %arg1: i32) -> (i32, i32) {
    %c0_i32 = arith.constant 0 : i32
    %c0_i32_0 = arith.constant 0 : i32
    %c0_i32_1 = arith.constant 0 : i32
    return %c0_i32, %c0_i32_0 : i32, i32
  }
  func.func @transform_9(%arg0: i32, %arg1: i32) -> (i32, i32) {
    %c0_i32 = arith.constant 0 : i32
    %c0_i32_0 = arith.constant 0 : i32
    %c0_i32_1 = arith.constant 0 : i32
    return %c0_i32, %c0_i32_0 : i32, i32
  }
}

</mosaic_0001>

<bundles_post_ra>
// kernel: tpu_custom_call.1
= control target key start
LH: loop header
LB: loop body
LE: loop exit
PB: predicated region body
PF: predicated region fallthrough
CT: control target
= control target key end

     0   :  { %s2366_s0 = inlined_call_operand.vmem [shape: bf16[128,144], index: 0, kind: input, shape index: {}]   ;;  %s2367_s1 = inlined_call_operand.hbm [shape: bf16[144,128], index: 1, kind: input, shape index: {}]   ;;  %s2368_s2 = inlined_call_operand.hbm [shape: bf16[3,16,128], index: 2, kind: input, shape index: {}]   ;;  %s2369_s3 = inlined_call_operand.vmem [shape: bf16[3,128,128], index: 3, kind: input, shape index: {}]   ;;  %s2370_s4 = inlined_call_operand.vmem [shape: f32[3,1,128], index: 4, kind: input, shape index: {}]   ;;  %s2371_s5 = inlined_call_operand.hbm [shape: bf16[3,128,128], index: 5, kind: input, shape index: {}]   ;;  %s2372_s6 = inlined_call_operand.vmem [shape: f32[3,1,128], index: 6, kind: input, shape index: {}]   ;;  %s2373_s7 = inlined_call_operand.vmem [shape: bf16[8,128], index: 7, kind: input, shape index: {}]   ;;  %s2374_s8 = inlined_call_operand.vmem [shape: f32[8,128], index: 8, kind: input, shape index: {}]   ;;  %s2375_s9 = inlined_call_operand.hbm [shape: f32[8,128], index: 9, kind: output, shape index: {}]  }
   0x1   :  { %2380 = sst [smem:[#allocation23_spill]] %s2368_s2 }
   0x2   :  { %2381 = sst [smem:[#allocation24_spill]] %s2371_s5 }
   0x3   :  { %14 = vsyncpa [#allocation6], 0 }
   0x4   :  { %16 = vsyncpa [#allocation6 + $0x1], 0 }
   0x5   :  { %17 = vsyncpa [#allocation9], 0 }
   0x6   :  { %19 = vsyncpa [#allocation9 + $0x1], 0 }
   0x7   :  { %20 = vsyncpa [#allocation7], 0  ;;  %s1921_s30 = smov 0   ;;  %s1923_s10 = smov 0  }
   0x8   :  { %s1925_s11 = smov 0   ;;  %s1927_s12 = smov 0  }
   0x9   :  { %s1929_s13 = smov 0   ;;  %s1931_s14 = smov 0  }
   0xa LB: > { %2382 = sst [smem:[#allocation21_spill]] %s1856_s13  ;;  %s2376_s15 = sadd.s32 4294967295, %s1860_s14   ;;  %s1860_s14 = sphi %s1931_s14, %s26_s14   ;;  %s1856_s13 = sphi %s1929_s13, %s2396_s13   ;;  %s1852_s12 = sphi %s1927_s12, %s2395_s12   ;;  %s1848_s11 = sphi %s1925_s11, %s2399_s11   ;;  %s1844_s10 = sphi %s1923_s10, %s2398_s10   ;;  %s1840_s30 = sphi %s1921_s30, %s2397_s30  }
   0xb   : > { %s38_s16 = sadd.s32 1, %s1856_s13  ;;  %s45_s17 = sadd.s32 1, %s1848_s11 }
   0xc   : > { %p40_p0 = scmp.ge.s32.totalorder %s38_s16, 3  ;;  %p52_p1 = scmp.ne.s32.totalorder %s1848_s11, %s1844_s10 }
   0xd   : > { %p53_p2 = scmp.eq.s32.totalorder %s1860_s14, 0  ;;  %p58_p4 = scmp.ne.s32.totalorder %s1844_s10, %s1840_s30 }
   0xe   : > { %s2401_s16 = smov (%p40_p0, %s38_s16), 0  ;;  %p59_p5 = scmp.eq.s32.totalorder %s2376_s15, 0 }
   0xf   : > { %2383 = sst [smem:[#allocation22_spill]] %s2401_s16  ;;  %p1957_p3 = por %p53_p2, %p52_p1 }
  0x10   : > { %s42_s19 = ssub.s32 %s1856_s13, %s2401_s16  ;;  %p1966_p7 = por %p59_p5, %p58_p4 }
  0x11   : > { %p43_p6 = scmp.eq.s32.totalorder %s42_s19, 0  ;;  %p1615_p8 = scmp.lt.s32.totalorder %s1860_s14, 3 }
  0x12   : > { %s2385_s20 = scalar_select %p1966_p7, 1, 0 }
  0x13   : > { %s1972_s21 = scalar_select %p43_p6, %s1848_s11, %s45_s17  }
  0x14   : > { %s1975_s22 = sand.u32 1, %s1848_s11   ;;  %s1467_s23 = sshll.u32 %s1856_s13, 7 }
  0x15   : > { %s1415_s24 = sshll.u32 %s1975_s22, 3  ;;  %s2386_s2 = sld [smem:[#allocation23_spill]] }
  0x16   : > { %s259_s28 = scalar_lea.vmem [#allocation5], %s1415_s24  ;;  %p1986_p9 = pnand %p1615_p8, %p1957_p3 }
  0x17   : > { %s266_s29 = sshll.u32 %s259_s28, 4  ;;  %s256_s17 = scalar_lea.sflag [#allocation6], %s1975_s22  ;;  %s1990_s29 = int_to_ptr.vmem [resolvable:$true] %s266_s29 }
  0x18   : > { %p1692_p11 = pneg %p1986_p9 }
  0x1b   : > { %s1982_s27 = scalar_lea.hbm %s2386_s2, %s1467_s23  ;;  %s1695_s18 = scalar_lea.hbm %s2386_s2, 384 }
  0x1c   : > { %s1690_s19 = scalar_lea.hbm %s1982_s27, 128  ;;  %p1696_p0 = scmp.lt.u32.totalorder %s1982_s27, %s2386_s2 }
  0x1d   : > { %p1691_p10 = scmp.ne.s32.totalorder %s1982_s27, %s1690_s19  ;;  %p1697_p1 = scmp.lt.u32.totalorder %s1695_s18, %s1690_s19 }
  0x1e   : > { %p1699_p3 = scmp.lt.u32.totalorder %s1690_s19, %s1982_s27 }
  0x1f   : > { %p1693_p12 = pnand %p1692_p11, %p1691_p10  ;;  %p1698_p2 = por %p1697_p1, %p1696_p0 }
  0x21   : > { %p1694_p13 = pneg %p1693_p12  ;;  %p1700_p4 = por %p1699_p3, %p1698_p2 }
  0x23   : > { %p1701_p5 = pnand %p1700_p4, %p1694_p13 }
  0x25   : > { %1704 = shalt.err (!%p1701_p5)
}
  0x26   : > { %s1705_s28 = scalar_lea.vmem %s1990_s29, 128  ;;  %s1862_s23 = smov [#allocation5]  }
  0x27   : > { %p1706_p6 = scmp.ne.s32.totalorder %s1990_s29, %s1705_s28  ;;  %s1710_s24 = sshll.u32 %s1862_s23, 4  ;;  %s1711_s24 = int_to_ptr.vmem [resolvable:$false] %s1710_s24 }
  0x28   : > { %s1712_s25 = scalar_lea.vmem %s1711_s24, 256  ;;  %p1713_p12 = scmp.lt.s32.totalorder %s1990_s29, %s1711_s24 }
  0x29   : > { %p1708_p8 = pnand %p1706_p6, %p1692_p11  ;;  %p1714_p0 = scmp.lt.s32.totalorder %s1712_s25, %s1705_s28 }
  0x2b   : > { %p1709_p10 = pneg %p1708_p8  ;;  %p1715_p1 = por %p1714_p0, %p1713_p12 }
  0x2d   : > { %p1716_p2 = pnand %p1715_p1, %p1709_p10 }
  0x2f   : > { %1719 = shalt.err (!%p1716_p2)
}
  0x30   : > { %s1863_s19 = smov 64   ;;  %s1864_s18 = smov 4  }
  0x31   : > { %1611 = dma.hbm_to_vmem [thread:$0]  (!%p1986_p9), %s1982_s27, 128, %s1990_s29, %s256_s17, %s1863_s19, %s1863_s19, %s1864_s18  }
  0x32   : > { %p1421_p13 = scmp.ge.s32.totalorder %s1860_s14, 1  ;;  %p315_p3 = scmp.lt.s32.totalorder %s1860_s14, 4 }
  0x33   : > { %s1418_s26 = sshll.u32 %s1975_s22, 6  ;;  %s1468_s23 = sshll.u32 %s1856_s13, 10 }
  0x34   : > { %p2026_p4 = pnand %p1421_p13, %p315_p3  ;;  %s294_s24 = scalar_lea.vmem [#allocation8], %s1418_s26 }
  0x35   : > { %s301_s25 = sshll.u32 %s294_s24, 4  ;;  %s2389_s5 = sld [smem:[#allocation24_spill]]  ;;  %s2036_s25 = int_to_ptr.vmem [resolvable:$true] %s301_s25 }
  0x36   : > { %s291_s27 = scalar_lea.sflag [#allocation9], %s1975_s22 }
  0x3b   : > { %s2034_s16 = scalar_lea.hbm %s2389_s5, %s1468_s23  ;;  %s1725_s24 = scalar_lea.hbm %s2389_s5, 3072 }
  0x3c   : > { %s1720_s29 = scalar_lea.hbm %s2034_s16, 1024  ;;  %p1726_p10 = scmp.lt.u32.totalorder %s2034_s16, %s2389_s5 }
  0x3d   : > { %p1721_p5 = scmp.ne.s32.totalorder %s2034_s16, %s1720_s29  ;;  %p1727_p12 = scmp.lt.u32.totalorder %s1725_s24, %s1720_s29 }
  0x3e   : > { %p1729_p1 = scmp.lt.u32.totalorder %s1720_s29, %s2034_s16 }
  0x3f   : > { %p1723_p6 = pnand %p1721_p5, %p1692_p11  ;;  %p1728_p0 = por %p1727_p12, %p1726_p10 }
  0x41   : > { %p1724_p8 = pneg %p1723_p6  ;;  %p1730_p2 = por %p1729_p1, %p1728_p0 }
  0x43   : > { %p1731_p13 = pnand %p1730_p2, %p1724_p8 }
  0x45   : > { %1734 = shalt.err (!%p1731_p13)
}
  0x46   : > { %s1735_s23 = scalar_lea.vmem %s2036_s25, 1024  ;;  %s1865_s17 = smov [#allocation8]  }
  0x47   : > { %p1736_p3 = scmp.ne.s32.totalorder %s2036_s25, %s1735_s23  ;;  %s1740_s26 = sshll.u32 %s1865_s17, 4  ;;  %s1741_s26 = int_to_ptr.vmem [resolvable:$false] %s1740_s26 }
  0x48   : > { %s1742_s2 = scalar_lea.vmem %s1741_s26, 2048  ;;  %p1743_p7 = scmp.lt.s32.totalorder %s2036_s25, %s1741_s26 }
  0x49   : > { %p1738_p5 = pnand %p1736_p3, %p1692_p11  ;;  %p1744_p10 = scmp.lt.s32.totalorder %s1742_s2, %s1735_s23 }
  0x4b   : > { %p1739_p6 = pneg %p1738_p5  ;;  %p1745_p12 = por %p1744_p10, %p1743_p7 }
  0x4d   : > { %p1746_p0 = pnand %p1745_p12, %p1739_p6 }
  0x4f   : > { %1749 = shalt.err (!%p1746_p0)
}
  0x50   : > { %1614 = dma.hbm_to_vmem [thread:$0]  (!%p1986_p9), %s2034_s16, 1024, %s2036_s25, %s291_s27, %s1863_s19, %s1863_s19, %s1864_s18  }
  0x51   : > { %319 = sbr.rel (%p2026_p4) target bundleno = 1166 (0x48e), region = 48  ;;  %s321_s29 = sand.u32 (!%p2026_p4), 1, %s1844_s10  }
  0x52   : > { %s1422_s24 = sshll.u32 (!%p2026_p4), %s321_s29, 3  ;;  %s322_s15 = scalar_lea.sflag (!%p2026_p4), [#allocation6], %s321_s29 }
  0x53   : > { %s2070_s23 = scalar_lea.vmem (!%p2026_p4), [#allocation5], %s1422_s24  ;;  %p2390_p7 = scmp.ne.s32.totalorder (!%p2026_p4), %s2385_s20, 0 }
  0x58   : > { %1823 = dma.done.wait (%p2390_p7), %s322_s15, 128  }
  0x59   : > { %1825 = vsyncadd (%p2390_p7), %s322_s15, 4294967168  ;;  %s1423_s22 = sshll.u32 %s321_s29, 6  ;;  %s331_s30 = scalar_lea.sflag [#allocation9], %s321_s29 }
  0x5a   : > { %s2076_s17 = scalar_lea.vmem [#allocation8], %s1423_s22 }
  0x5b   : > { %1827 = dma.done.wait (%p2390_p7), %s331_s30, 1024  }
  0x5c   : > { %1829 = vsyncadd (%p2390_p7), %s331_s30, 4294966272  ;;  %p376_p9 = scmp.lt.s32.totalorder %s1852_s12, 2  ;;  %s389_s16 = ssub.s32 0, %s1852_s12 }
  0x5d   : > { %p400_p11 = scmp.eq.s32.totalorder %s1852_s12, 0  ;;  %p388_p4 = scmp.lt.s32.totalorder %s1852_s12, 0 }
  0x5e   : > { %s2088_s19 = scalar_select %p376_p9, %s1852_s12, 2 }
  0x5f   : > { %s1426_s18 = smin.u32 %s1852_s12, %s389_s16  ;;  %v423_v0 = vld [vmem:[%s2366_s0] sm:$0xf] (%p400_p11)  ;;  %v425_v1 = vld [vmem:[%s2366_s0 + $0x8] sm:$0xf] (%p400_p11)  ;;  %v427_v2 = vld [vmem:[%s2366_s0 + $0x4] sm:$0xf] (%p400_p11) }
  0x60   : > { %s1469_s20 = sshll.u32 %s2088_s19, 6  ;;  %s383_s27 = scalar_lea.vmem %s2370_s4, %s2088_s19  ;;  %424 = vst [vmem:[#allocation3] sm:$0xf] (%p400_p11), %v423_v0  ;;  %426 = vst [vmem:[#allocation3 + $0x4] sm:$0xf] (%p400_p11), %v425_v1  ;;  %v429_v3 = vld [vmem:[%s2366_s0 + $0xc] sm:$0xff] (%p400_p11)  }
  0x61   : > { %s2100_s29 = scalar_lea.vmem %s2369_s3, %s1469_s20  ;;  %s386_s22 = scalar_lea.vmem %s2372_s6, %s2088_s19  ;;  %428 = vst [vmem:[#allocation3 + $0x8] sm:$0xf] (%p400_p11), %v427_v2  ;;  %v433_v4 = vld [vmem:[%s2366_s0 + $0x18] sm:$0xf] (%p400_p11)  ;;  %v435_v5 = vld [vmem:[%s2366_s0 + $0x14] sm:$0xf] (%p400_p11) }
  0x62   : > { %s391_s30 = sand.u32 1, %s1426_s18   ;;  %405 = sbr.rel (!%p400_p11) target bundleno = 132 (0x84), region = 60  ;;  %430 = vst [vmem:[#allocation3 + $0xc] sm:$0xff] (%p400_p11), %v429_v3   ;;  %434 = vst [vmem:[#allocation3 + $0x14] sm:$0xf] (%p400_p11), %v433_v4  ;;  %v437_v6 = vld [vmem:[%s2366_s0 + $0x1c] sm:$0xff] (%p400_p11)  }
  0x63   : > { %s392_s5 = ssub.s32 0, %s391_s30  ;;  %436 = vst [vmem:[#allocation3 + $0x18] sm:$0xf] (%p400_p11), %v435_v5  ;;  %v441_v7 = vld [vmem:[%s2366_s0 + $0x28] sm:$0xf] (%p400_p11)  ;;  %438 = vst [vmem:[#allocation3 + $0x1c] sm:$0xff] (%p400_p11), %v437_v6  }
  0x64   : > { %s2403_s5 = smov (!%p388_p4, %s392_s5), %s391_s30  ;;  %v443_v8 = vld [vmem:[%s2366_s0 + $0x24] sm:$0xf] (%p400_p11)  ;;  %442 = vst [vmem:[#allocation3 + $0x24] sm:$0xf] (%p400_p11), %v441_v7  ;;  %v445_v9 = vld [vmem:[%s2366_s0 + $0x2c] sm:$0xff] (%p400_p11)   ;;  %v453_v12 = vld [vmem:[%s2366_s0 + $0x3c] sm:$0xff] (%p400_p11)  }
  0x65   : > { %p1428_p8 = scmp.lt.s32.totalorder %s2403_s5, 0  ;;  %s398_s13 = sadd.s32 2, %s2403_s5  ;;  %444 = vst [vmem:[#allocation3 + $0x28] sm:$0xf] (%p400_p11), %v443_v8  ;;  %v449_v10 = vld [vmem:[%s2366_s0 + $0x38] sm:$0xf] (%p400_p11) }
  0x66   : > { %v451_v11 = vld [vmem:[%s2366_s0 + $0x34] sm:$0xf] (%p400_p11)  ;;  %446 = vst [vmem:[#allocation3 + $0x2c] sm:$0xff] (%p400_p11), %v445_v9   ;;  %450 = vst [vmem:[#allocation3 + $0x34] sm:$0xf] (%p400_p11), %v449_v10  ;;  %v461_v15 = vld [vmem:[%s2366_s0 + $0x4c] sm:$0xff] (%p400_p11)  }
  0x67   : > { %s2405_s13 = smov (!%p1428_p8, %s398_s13), %s2403_s5  ;;  %452 = vst [vmem:[#allocation3 + $0x38] sm:$0xf] (%p400_p11), %v451_v11  ;;  %v457_v13 = vld [vmem:[%s2366_s0 + $0x48] sm:$0xf] (%p400_p11)  ;;  %v459_v14 = vld [vmem:[%s2366_s0 + $0x44] sm:$0xf] (%p400_p11) }
  0x68   : > { %454 = vst [vmem:[#allocation3 + $0x3c] sm:$0xff] (%p400_p11), %v453_v12   ;;  %458 = vst [vmem:[#allocation3 + $0x44] sm:$0xf] (%p400_p11), %v457_v13  ;;  %v465_v16 = vld [vmem:[%s2366_s0 + $0x58] sm:$0xf] (%p400_p11)  ;;  %v469_v18 = vld [vmem:[%s2366_s0 + $0x5c] sm:$0xff] (%p400_p11)  }
  0x69   : > { %460 = vst [vmem:[#allocation3 + $0x48] sm:$0xf] %v459_v14  ;;  %v467_v17 = vld [vmem:[%s2366_s0 + $0x54] sm:$0xf]  ;;  %462 = vst [vmem:[#allocation3 + $0x4c] sm:$0xff] %v461_v15   ;;  %v477_v21 = vld [vmem:[%s2366_s0 + $0x6c] sm:$0xff]  }
  0x6a   : > { %466 = vst [vmem:[#allocation3 + $0x54] sm:$0xf] %v465_v16  ;;  %468 = vst [vmem:[#allocation3 + $0x58] sm:$0xf] %v467_v17  ;;  %v473_v19 = vld [vmem:[%s2366_s0 + $0x68] sm:$0xf] }
  0x6b   : > { %v475_v20 = vld [vmem:[%s2366_s0 + $0x64] sm:$0xf]  ;;  %470 = vst [vmem:[#allocation3 + $0x5c] sm:$0xff] %v469_v18   ;;  %474 = vst [vmem:[#allocation3 + $0x64] sm:$0xf] %v473_v19 }
  0x6c   : > { %476 = vst [vmem:[#allocation3 + $0x68] sm:$0xf] %v475_v20  ;;  %v481_v22 = vld [vmem:[%s2366_s0 + $0x78] sm:$0xf]  ;;  %v483_v23 = vld [vmem:[%s2366_s0 + $0x74] sm:$0xf] }
  0x6d   : > { %478 = vst [vmem:[#allocation3 + $0x6c] sm:$0xff] %v477_v21   ;;  %482 = vst [vmem:[#allocation3 + $0x74] sm:$0xf] %v481_v22  ;;  %v485_v24 = vld [vmem:[%s2366_s0 + $0x7c] sm:$0xf] }
  0x6e   : > { %484 = vst [vmem:[#allocation3 + $0x78] sm:$0xf] %v483_v23  ;;  %486 = vst [vmem:[#allocation3 + $0x7c] sm:$0xf] %v485_v24 }
  0x6f   : > { %581 = vsyncadd [#allocation4], 2048  ;;  %s1866_s5 = smov [#allocation2]   ;;  %s1750_s30 = scalar_lea.hbm %s2367_s1, 1152 }
  0x70   : > { %s590_s18 = sshll.u32 %s1866_s5, 4  ;;  %p1751_p1 = scmp.ne.s32.totalorder %s2367_s1, %s1750_s30  ;;  %s591_s18 = int_to_ptr.vmem [resolvable:$true] %s590_s18 }
  0x71   : > { %p1754_p2 = scmp.lt.u32.totalorder %s1750_s30, %s2367_s1 }
  0x73   : > { %p1756_p13 = pnand %p1754_p2, %p1751_p1 }
  0x75   : > { %1759 = shalt.err (!%p1756_p13)  }
  0x76   : > { %s1760_s26 = scalar_lea.vmem %s591_s18, 1152  ;;  %s1764_s2 = scalar_lea.vmem %s591_s18, 2304 }
  0x77   : > { %p1761_p3 = scmp.ne.s32.totalorder %s591_s18, %s1760_s26  ;;  %p1765_p5 = scmp.lt.s32.totalorder %s591_s18, %s591_s18 }
  0x78   : > { %p1766_p6 = scmp.lt.s32.totalorder %s1764_s2, %s1760_s26 }
  0x7a   : > { %p1767_p10 = por %p1766_p6, %p1765_p5 }
  0x7c   : > { %p1768_p12 = pnand %p1767_p10, %p1761_p3 }
  0x7e   : > { %1771 = shalt.err (!%p1768_p12)  }
  0x7f   : > { %593 = dma.hbm_to_vmem [thread:$0]  %s2367_s1, 1152, %s591_s18, [#allocation4 + $0x1] }
  0x80   : > { %1830 = dma.done.wait [#allocation4], 2048 }
  0x81   : > { %1831 = vsyncadd [#allocation4], 4294965248 }
  0x82   : > { %1832 = dma.done.wait [#allocation4 + $0x1], 1152 }
  0x83   : > { %1833 = vsyncadd [#allocation4 + $0x1], 4294966144 }
  0x84 PF: > { %s1471_s15 = smul.u32 72, %s2405_s13  ;;  %v1867_v25 = vmov 0   ;;  %v1673_v26 = vld [vmem:[%s2070_s23] sm:$0xff]   ;;  %vm651_vm0 = vcmask 130048   ;;  %v1674_v31 = vld [vmem:[%s2100_s29] sm:$0xff]   ;;  %v1675_v32 = vld [vmem:[%s2100_s29 + $0x8] sm:$0xff]  }
  0x85   : > { %676 = vmatprep.subr.bf16.mxu0 %v1867_v25  ;;  %v624_v27 = vld [vmem:[#allocation3 + $0x8] sm:$0xff]  ;;  %1516 = vmatprep.subr.bf16.mxu1 %v1674_v31  ;;  %v1676_v34 = vld [vmem:[%s2100_s29 + $0x10] sm:$0xff]   ;;  %v1678_v38 = vld [vmem:[%s2100_s29 + $0x20] sm:$0xff]   ;;  %p1198_p0 = scmp.eq.s32.totalorder %s1852_s12, 2  ;;  %s1185_s16 = ssub.s32 1, %s2405_s13 }
  0x86   : > { %1433 = vmatprep.mubr.msk.bf16.mxu0 %vm651_vm0, %v624_v27  ;;  %s2200_s30 = scalar_lea.vmem [#allocation2], %s1471_s15  ;;  %1517 = vmatpush3.bf16.msra.mxu1 %v1674_v31  ;;  %v1677_v36 = vld [vmem:[%s2100_s29 + $0x18] sm:$0xff]   ;;  %v623_v41 = vld [vmem:[#allocation3] sm:$0xff]  ;;  %v626_v42 = vld [vmem:[#allocation3 + $0x18] sm:$0xff]  ;;  %s1473_s28 = smul.u32 72, %s1185_s16  ;;  %vm1869_vm2 = vmmov (%p1198_p0), 0  }
  0x87   : > { %v642_v28 = vld [vmem:[%s2200_s30] sm:$0xff]  ;;  %616 = vst [vmem:[%s2200_s30 + $0x40] sm:$0xff] %v1673_v26  ;;  %v643_v29 = vld [vmem:[%s2200_s30 + $0x8] sm:$0xff]  ;;  %v644_v30 = vld [vmem:[%s2200_s30 + $0x10] sm:$0xff]  ;;  %1518 = vmatprep.subr.bf16.mxu1 %v1675_v32 }
  0x88   : > { %677 = vmatpush1.bf16.msra.mxu0 %v642_v28  ;;  %v645_v33 = vld [vmem:[%s2200_s30 + $0x18] sm:$0xff]  ;;  %v646_v35 = vld [vmem:[%s2200_s30 + $0x20] sm:$0xff]  ;;  %v647_v37 = vld [vmem:[%s2200_s30 + $0x28] sm:$0xff]  ;;  %s2266_s13 = scalar_lea.vmem [#allocation2], %s1473_s28 }
  0x89   : > { %678 = vmatprep.subr.bf16.mxu0 %v1867_v25  ;;  %v648_v39 = vld [vmem:[%s2200_s30 + $0x30] sm:$0xff]  ;;  %v649_v40 = vld [vmem:[%s2200_s30 + $0x38] sm:$0xff]  ;;  %v634_v50 = vld [vmem:[#allocation3 + $0x58] sm:$0xff] }
  0x8a   : > { %1519 = vmatpush3.bf16.msra.mxu1 %v1675_v32  ;;  %v625_v43 = vld [vmem:[#allocation3 + $0x10] sm:$0xff]  ;;  %v628_v44 = vld [vmem:[#allocation3 + $0x28] sm:$0xff]  ;;  %v627_v45 = vld [vmem:[#allocation3 + $0x20] sm:$0xff] }
  0x8b   : > { %1520 = vmatprep.subr.bf16.mxu1 %v1676_v34  ;;  %v630_v46 = vld [vmem:[#allocation3 + $0x38] sm:$0xff]  ;;  %v629_v47 = vld [vmem:[#allocation3 + $0x30] sm:$0xff]  ;;  %v632_v48 = vld [vmem:[#allocation3 + $0x48] sm:$0xff] }
  0x8c   : > { %679 = vmatpush1.bf16.msra.mxu0 %v643_v29  ;;  %v631_v49 = vld [vmem:[#allocation3 + $0x40] sm:$0xff]  ;;  %v633_v51 = vld [vmem:[#allocation3 + $0x50] sm:$0xff]  ;;  %v636_v52 = vld [vmem:[#allocation3 + $0x68] sm:$0xff] }
  0x8d   : > { %680 = vmatprep.subr.bf16.mxu0 %v1867_v25  ;;  %v635_v53 = vld [vmem:[#allocation3 + $0x60] sm:$0xff]  ;;  %v638_v54 = vld [vmem:[#allocation3 + $0x78] sm:$0xff]  ;;  %v637_v55 = vld [vmem:[#allocation3 + $0x70] sm:$0xff] }
  0x8e   : > { %1521 = vmatpush3.bf16.msra.mxu1 %v1676_v34  ;;  %v1679_v56 = vld [vmem:[%s2100_s29 + $0x28] sm:$0xff]   ;;  %v1680_v57 = vld [vmem:[%s2100_s29 + $0x30] sm:$0xff]   ;;  %v1681_v58 = vld [vmem:[%s2100_s29 + $0x38] sm:$0xff]  }
  0x8f   : > { %1522 = vmatprep.subr.bf16.mxu1 %v1677_v36  ;;  %v1682_v59 = vld [vmem:[%s2076_s17] sm:$0xff]   ;;  %v1683_v6 = vld [vmem:[%s2076_s17 + $0x8] sm:$0xff]   ;;  %v1684_v7 = vld [vmem:[%s2076_s17 + $0x10] sm:$0xff]  }
  0x90   : > { %681 = vmatpush1.bf16.msra.mxu0 %v644_v30  ;;  %v1685_v13 = vld [vmem:[%s2076_s17 + $0x18] sm:$0xff]   ;;  %v1686_v14 = vld [vmem:[%s2076_s17 + $0x20] sm:$0xff]   ;;  %v1687_v20 = vld [vmem:[%s2076_s17 + $0x28] sm:$0xff]  }
  0x91   : > { %682 = vmatprep.subr.bf16.mxu0 %v1867_v25 }
  0x92   : > { %1523 = vmatpush3.bf16.msra.mxu1 %v1677_v36 }
  0x93   : > { %1524 = vmatprep.subr.bf16.mxu1 %v1678_v38 }
  0x94   : > { %683 = vmatpush1.bf16.msra.mxu0 %v645_v33 }
  0x95   : > { %684 = vmatprep.subr.bf16.mxu0 %v1867_v25 }
  0x96   : > { %1525 = vmatpush3.bf16.msra.mxu1 %v1678_v38 }
  0x97   : > { %1526 = vmatprep.subr.bf16.mxu1 %v1679_v56 }
  0x98   : > { %685 = vmatpush1.bf16.msra.mxu0 %v646_v35 }
  0x99   : > { %686 = vmatprep.subr.bf16.mxu0 %v1867_v25 }
  0x9a   : > { %1527 = vmatpush3.bf16.msra.mxu1 %v1679_v56 }
  0x9b   : > { %1528 = vmatprep.subr.bf16.mxu1 %v1680_v57 }
  0x9c   : > { %687 = vmatpush1.bf16.msra.mxu0 %v647_v37 }
  0x9d   : > { %688 = vmatprep.subr.bf16.mxu0 %v1867_v25 }
  0x9e   : > { %1529 = vmatpush3.bf16.msra.mxu1 %v1680_v57 }
  0x9f   : > { %1530 = vmatprep.subr.bf16.mxu1 %v1681_v58 }
  0xa0   : > { %689 = vmatpush1.bf16.msra.mxu0 %v648_v39 }
  0xa1   : > { %690 = vmatprep.subr.bf16.mxu0 %v1867_v25 }
  0xa2   : > { %1531 = vmatpush3.bf16.msra.mxu1 %v1681_v58 }
  0xa3   : > { %1548 = vmatprep.subr.bf16.mxu1 %v1682_v59 }
  0xa4   : > { %691 = vmatpush1.bf16.msra.mxu0 %v649_v40 }
  0xa5   : > { %692 = vmatprep.subr.bf16.mxu0 %v1867_v25 }
  0xa8   : > { %693 = vmatpush1.bf16.msra.mxu0 %v1673_v26 }
  0xab   : > { %709 = vmatmul.mubr.bf16.vlgmr.msra.gmra.mrb[0].mxu0 %v623_v41  ;;  %v1688_v41 = vld [vmem:[%s2076_s17 + $0x30] sm:$0xff]  }
  0xac   : > { %1434 = vmatprep.mubr.msk.bf16.mxu0 %vm651_vm0, %v626_v42  ;;  %v1689_v42 = vld [vmem:[%s2076_s17 + $0x38] sm:$0xff]   ;;  %s1158_s17 = scalar_select %p376_p9, 1, 0 }
  0xb3   : > { %717 = vmatmul.mubr.bf16.gmra.mrb[4].mxu0 %v625_v43  ;;  %v1441_v43 = vld [vmem:[%s383_s27] ss:$0 sm:$0xff] }
  0xb4   : > { %1435 = vmatprep.mubr.msk.bf16.mxu0 %vm651_vm0, %v628_v44 }
  0xbb   : > { %725 = vmatmul.mubr.bf16.gmra.mrb[8].mxu0 %v627_v45 }
  0xbc   : > { %1436 = vmatprep.mubr.msk.bf16.mxu0 %vm651_vm0, %v630_v46 }
  0xc3   : > { %733 = vmatmul.mubr.bf16.gmra.mrb[12].mxu0 %v629_v47 }
  0xc4   : > { %1437 = vmatprep.mubr.msk.bf16.mxu0 %vm651_vm0, %v632_v48 }
  0xcb   : > { %741 = vmatmul.mubr.bf16.gmra.mrb[16].mxu0 %v631_v49 }
  0xcc   : > { %1438 = vmatprep.mubr.msk.bf16.mxu0 %vm651_vm0, %v634_v50 }
  0xd3   : > { %749 = vmatmul.mubr.bf16.gmra.mrb[20].mxu0 %v633_v51 }
  0xd4   : > { %1439 = vmatprep.mubr.msk.bf16.mxu0 %vm651_vm0, %v636_v52 }
  0xdb   : > { %757 = vmatmul.mubr.bf16.gmra.mrb[24].mxu0 %v635_v53 }
  0xdc   : > { %1440 = vmatprep.mubr.msk.bf16.mxu0 %vm651_vm0, %v638_v54 }
  0xe3   : > { %765 = vmatmul.mubr.bf16.gmra.mrb[28].mxu0 %v637_v55 }
 0x17e   : > { %v710_v60 = vpop.f32.mrb[0].mxu0 }
 0x17f   : > { %v712_v61 = vpop.f32.mrb[1].mxu0 }
 0x180   : > { %v713_v62 = vpop.f32.mrb[2].mxu0 }
 0x181   : > { %v715_v63 = vpop.f32.mrb[3].mxu0  ;;  %v773_v0 = vpack.c.bf16 %v713_v62, %v710_v60 }
 0x183   : > { %1532 = vmatprep.mubr.bf16.mxu1 %v773_v0 }
 0x186   : > { %v718_v1 = vpop.f32.mrb[4].mxu0 }
 0x187   : > { %v720_v2 = vpop.f32.mrb[5].mxu0 }
 0x188   : > { %v721_v3 = vpop.f32.mrb[6].mxu0 }
 0x189   : > { %v774_v4 = vpack.c.bf16 %v721_v3, %v718_v1  ;;  %v723_v5 = vpop.f32.mrb[7].mxu0 }
 0x18b   : > { %1533 = vmatmul.mubr.bf16.vlgmr.msra.gmra.mrb[0].mxu1 %v774_v4 }
 0x18c   : > { %1549 = vmatpush3.bf16.msra.mxu1 %v1682_v59 }
 0x18d   : > { %1550 = vmatprep.subr.bf16.mxu1 %v1683_v6 }
 0x18e   : > { %v726_v8 = vpop.f32.mrb[8].mxu0 }
 0x18f   : > { %v728_v9 = vpop.f32.mrb[9].mxu0 }
 0x190   : > { %v729_v10 = vpop.f32.mrb[10].mxu0  ;;  %1551 = vmatpush3.bf16.msra.mxu1 %v1683_v6 }
 0x191   : > { %v775_v11 = vpack.c.bf16 %v729_v10, %v726_v8  ;;  %v731_v12 = vpop.f32.mrb[11].mxu0  ;;  %1552 = vmatprep.subr.bf16.mxu1 %v1684_v7 }
 0x193   : > { %1536 = vmatprep.mubr.bf16.mxu1 %v775_v11 }
 0x194   : > { %1553 = vmatpush3.bf16.msra.mxu1 %v1684_v7 }
 0x195   : > { %1554 = vmatprep.subr.bf16.mxu1 %v1685_v13 }
 0x196   : > { %v734_v15 = vpop.f32.mrb[12].mxu0 }
 0x197   : > { %v736_v16 = vpop.f32.mrb[13].mxu0 }
 0x198   : > { %v737_v17 = vpop.f32.mrb[14].mxu0  ;;  %1555 = vmatpush3.bf16.msra.mxu1 %v1685_v13 }
 0x199   : > { %v776_v18 = vpack.c.bf16 %v737_v17, %v734_v15  ;;  %v739_v19 = vpop.f32.mrb[15].mxu0  ;;  %1556 = vmatprep.subr.bf16.mxu1 %v1686_v14 }
 0x19b   : > { %1537 = vmatmul.mubr.bf16.gmra.mrb[4].mxu1 %v776_v18 }
 0x19c   : > { %1557 = vmatpush3.bf16.msra.mxu1 %v1686_v14 }
 0x19d   : > { %1558 = vmatprep.subr.bf16.mxu1 %v1687_v20 }
 0x19e   : > { %v742_v21 = vpop.f32.mrb[16].mxu0 }
 0x19f   : > { %v744_v22 = vpop.f32.mrb[17].mxu0 }
 0x1a0   : > { %v745_v23 = vpop.f32.mrb[18].mxu0  ;;  %1559 = vmatpush3.bf16.msra.mxu1 %v1687_v20 }
 0x1a1   : > { %v777_v24 = vpack.c.bf16 %v745_v23, %v742_v21  ;;  %v747_v25 = vpop.f32.mrb[19].mxu0  ;;  %1560 = vmatprep.subr.bf16.mxu1 %v1688_v41 }
 0x1a3   : > { %1540 = vmatprep.mubr.bf16.mxu1 %v777_v24 }
 0x1a4   : > { %1561 = vmatpush3.bf16.msra.mxu1 %v1688_v41 }
 0x1a5   : > { %1562 = vmatprep.subr.bf16.mxu1 %v1689_v42 }
 0x1a6   : > { %v750_v26 = vpop.f32.mrb[20].mxu0 }
 0x1a7   : > { %v752_v27 = vpop.f32.mrb[21].mxu0 }
 0x1a8   : > { %v753_v28 = vpop.f32.mrb[22].mxu0  ;;  %1563 = vmatpush3.bf16.msra.mxu1 %v1689_v42 }
 0x1a9   : > { %v778_v29 = vpack.c.bf16 %v753_v28, %v750_v26  ;;  %v755_v30 = vpop.f32.mrb[23].mxu0 }
 0x1ab   : > { %1541 = vmatmul.mubr.bf16.gmra.mrb[8].mxu1 %v778_v29 }
 0x1ae   : > { %v758_v31 = vpop.f32.mrb[24].mxu0 }
 0x1af   : > { %v760_v32 = vpop.f32.mrb[25].mxu0 }
 0x1b0   : > { %v761_v33 = vpop.f32.mrb[26].mxu0 }
 0x1b1   : > { %v779_v34 = vpack.c.bf16 %v761_v33, %v758_v31  ;;  %v763_v35 = vpop.f32.mrb[27].mxu0 }
 0x1b3   : > { %1544 = vmatprep.mubr.bf16.mxu1 %v779_v34 }
 0x1b6   : > { %v766_v36 = vpop.f32.mrb[28].mxu0 }
 0x1b7   : > { %v768_v37 = vpop.f32.mrb[29].mxu0 }
 0x1b8   : > { %v769_v38 = vpop.f32.mrb[30].mxu0 }
 0x1b9   : > { %v780_v39 = vpack.c.bf16 %v769_v38, %v766_v36  ;;  %v771_v40 = vpop.f32.mrb[31].mxu0  ;;  %v2247_v36 = vld [vmem:[%s386_s22] ss:$0 sm:$0xff] }
 0x1bb   : > { %1545 = vmatmul.mubr.bf16.gmra.mrb[12].mxu1 %v780_v39  ;;  %v1159_v39 = vstv %s1158_s17 }
 0x1bc   : > { %vm2253_vm1 = vcmp.eq.s32.totalorder %v1159_v39, 1 }
 0x25e   : > { %v1534_v44 = vpop.f32.mrb[0].mxu1 }
 0x25f   : > { %v895_v45 = vadd.f32 %v1534_v44, %v1441_v43  ;;  %v886_v46 = vpop.f32.mrb[1].mxu1 }
 0x260   : > { %v887_v47 = vadd.f32 %v1441_v43, %v886_v46  ;;  %v1535_v48 = vpop.f32.mrb[2].mxu1 }
 0x261   : > { %v898_v49 = vadd.f32 %v1535_v48, %v1441_v43  ;;  %v889_v50 = vpop.f32.mrb[3].mxu1  ;;  %v951_v52 = vmax.f32 %v895_v45, 0.0 }
 0x262   : > { %v890_v51 = vadd.f32 %v1441_v43, %v889_v50  ;;  %v949_v54 = vmax.f32 %v887_v47, 0.0 }
 0x263   : > { %v952_v53 = vmax.f32 %v898_v49, 0.0 }
 0x264   : > { %v950_v55 = vmax.f32 %v890_v51, 0.0 }
 0x265   : > { %v966_v56 = vpack.c.bf16 %v952_v53, %v951_v52 }
 0x266   : > { %v965_v57 = vpack.c.bf16 %v950_v55, %v949_v54 }
 0x268   : > { %1564 = vmatprep.mubr.bf16.mxu1 %v965_v57 }
 0x269   : > { %1565 = vmatmul.mubr.bf16.vlgmr.msra.gmra.mrb[16].mxu1 %v966_v56 }
 0x26e   : > { %v1538_v58 = vpop.f32.mrb[4].mxu1 }
 0x26f   : > { %v911_v59 = vadd.f32 %v1538_v58, %v1441_v43  ;;  %v902_v60 = vpop.f32.mrb[5].mxu1 }
 0x270   : > { %v903_v61 = vadd.f32 %v1441_v43, %v902_v60  ;;  %v1539_v62 = vpop.f32.mrb[6].mxu1 }
 0x271   : > { %v914_v63 = vadd.f32 %v1539_v62, %v1441_v43  ;;  %v905_v0 = vpop.f32.mrb[7].mxu1  ;;  %v955_v2 = vmax.f32 %v911_v59, 0.0 }
 0x272   : > { %v906_v1 = vadd.f32 %v1441_v43, %v905_v0  ;;  %v953_v4 = vmax.f32 %v903_v61, 0.0 }
 0x273   : > { %v956_v3 = vmax.f32 %v914_v63, 0.0 }
 0x274   : > { %v954_v5 = vmax.f32 %v906_v1, 0.0 }
 0x275   : > { %v968_v6 = vpack.c.bf16 %v956_v3, %v955_v2 }
 0x276   : > { %v967_v7 = vpack.c.bf16 %v954_v5, %v953_v4 }
 0x278   : > { %1568 = vmatprep.mubr.bf16.mxu1 %v967_v7 }
 0x279   : > { %1569 = vmatmul.mubr.bf16.gmra.mrb[20].mxu1 %v968_v6 }
 0x27e   : > { %v1542_v8 = vpop.f32.mrb[8].mxu1 }
 0x27f   : > { %v927_v9 = vadd.f32 %v1542_v8, %v1441_v43  ;;  %v918_v10 = vpop.f32.mrb[9].mxu1 }
 0x280   : > { %v919_v11 = vadd.f32 %v1441_v43, %v918_v10  ;;  %v1543_v12 = vpop.f32.mrb[10].mxu1 }
 0x281   : > { %v930_v13 = vadd.f32 %v1543_v12, %v1441_v43  ;;  %v921_v14 = vpop.f32.mrb[11].mxu1  ;;  %v959_v16 = vmax.f32 %v927_v9, 0.0 }
 0x282   : > { %v922_v15 = vadd.f32 %v1441_v43, %v921_v14  ;;  %v957_v18 = vmax.f32 %v919_v11, 0.0 }
 0x283   : > { %v960_v17 = vmax.f32 %v930_v13, 0.0 }
 0x284   : > { %v958_v19 = vmax.f32 %v922_v15, 0.0 }
 0x285   : > { %v970_v20 = vpack.c.bf16 %v960_v17, %v959_v16 }
 0x286   : > { %v969_v21 = vpack.c.bf16 %v958_v19, %v957_v18 }
 0x288   : > { %1572 = vmatprep.mubr.bf16.mxu1 %v969_v21 }
 0x289   : > { %1573 = vmatmul.mubr.bf16.gmra.mrb[24].mxu1 %v970_v20 }
 0x28e   : > { %v1546_v22 = vpop.f32.mrb[12].mxu1 }
 0x28f   : > { %v943_v23 = vadd.f32 %v1546_v22, %v1441_v43  ;;  %v934_v24 = vpop.f32.mrb[13].mxu1 }
 0x290   : > { %v935_v25 = vadd.f32 %v1441_v43, %v934_v24  ;;  %v1547_v26 = vpop.f32.mrb[14].mxu1 }
 0x291   : > { %v946_v27 = vadd.f32 %v1547_v26, %v1441_v43  ;;  %v937_v28 = vpop.f32.mrb[15].mxu1  ;;  %v963_v30 = vmax.f32 %v943_v23, 0.0 }
 0x292   : > { %v938_v29 = vadd.f32 %v1441_v43, %v937_v28  ;;  %v961_v32 = vmax.f32 %v935_v25, 0.0 }
 0x293   : > { %v964_v31 = vmax.f32 %v946_v27, 0.0 }
 0x294   : > { %v962_v33 = vmax.f32 %v938_v29, 0.0 }
 0x295   : > { %v972_v34 = vpack.c.bf16 %v964_v31, %v963_v30 }
 0x296   : > { %v971_v35 = vpack.c.bf16 %v962_v33, %v961_v32 }
 0x298   : > { %1576 = vmatprep.mubr.bf16.mxu1 %v971_v35 }
 0x299   : > { %1577 = vmatmul.mubr.bf16.gmra.mrb[28].mxu1 %v972_v34 }
 0x33c   : > { %v1566_v37 = vpop.f32.mrb[16].mxu1 }
 0x33d   : > { %v1087_v38 = vadd.f32 %v1566_v37, %v2247_v36  ;;  %v1078_v40 = vpop.f32.mrb[17].mxu1 }
 0x33e   : > { %v1079_v41 = vadd.f32 %v2247_v36, %v1078_v40  ;;  %v1567_v42 = vpop.f32.mrb[18].mxu1 }
 0x33f   : > { %v1144_v43 = vmax.f32 %v1087_v38, 0.0  ;;  %v1090_v44 = vadd.f32 %v1567_v42, %v2247_v36  ;;  %v1081_v45 = vpop.f32.mrb[19].mxu1 }
 0x340   : > { %v1142_v47 = vmax.f32 %v1079_v41, 0.0  ;;  %v1082_v48 = vadd.f32 %v2247_v36, %v1081_v45 }
 0x341   : > { %v1145_v49 = vmax.f32 %v1090_v44, 0.0  ;;  %v1163_v51 = vsel %vm2253_vm1, %v1144_v43, %v1087_v38 }
 0x342   : > { %v1143_v50 = vmax.f32 %v1082_v48, 0.0  ;;  %v1161_v53 = vsel %vm2253_vm1, %v1142_v47, %v1079_v41 }
 0x343   : > { %v1164_v52 = vsel %vm2253_vm1, %v1145_v49, %v1090_v44  ;;  %v1868_v49 = vmov (%p1198_p0), 0.0  }
 0x344   : > { %v1178_v54 = vpack.c.bf16 %v1164_v52, %v1163_v51  ;;  %v1162_v55 = vsel %vm2253_vm1, %v1143_v50, %v1082_v48  ;;  %1580 = vmatprep.subr.bf16.mxu0 (%p1198_p0), %v1868_v49  ;;  %1596 = vmatprep.mubr.msk.bf16.mxu0 (%p1198_p0), %vm1869_vm2, %v1868_v49 }
 0x345   : > { %v1177_v56 = vpack.c.bf16 %v1162_v55, %v1161_v53 }
 0x346   : > { %1191 = vst [vmem:[%s2266_s13 + $0x8] sm:$0xff] %v1178_v54 }
 0x347   : > { %1190 = vst [vmem:[%s2266_s13] sm:$0xff] %v1177_v56  ;;  %v1212_v56 = vld [vmem:[%s2373_s7] sm:$0xf] (%p1198_p0) }
 0x34c   : > { %v1570_v57 = vpop.f32.mrb[20].mxu1 }
 0x34d   : > { %v1103_v58 = vadd.f32 %v1570_v57, %v2247_v36  ;;  %v1094_v59 = vpop.f32.mrb[21].mxu1  ;;  %v1253_v57 = vld [vmem:[%s2374_s8] sm:$0xff] (%p1198_p0) }
 0x34e   : > { %v1095_v60 = vadd.f32 %v2247_v36, %v1094_v59  ;;  %v1571_v61 = vpop.f32.mrb[22].mxu1 }
 0x34f   : > { %v1148_v62 = vmax.f32 %v1103_v58, 0.0  ;;  %v1106_v63 = vadd.f32 %v1571_v61, %v2247_v36  ;;  %v1097_v0 = vpop.f32.mrb[23].mxu1 }
 0x350   : > { %v1146_v1 = vmax.f32 %v1095_v60, 0.0  ;;  %v1098_v2 = vadd.f32 %v2247_v36, %v1097_v0 }
 0x351   : > { %v1149_v3 = vmax.f32 %v1106_v63, 0.0  ;;  %v1167_v5 = vsel %vm2253_vm1, %v1148_v62, %v1103_v58 }
 0x352   : > { %v1147_v4 = vmax.f32 %v1098_v2, 0.0  ;;  %v1165_v7 = vsel %vm2253_vm1, %v1146_v1, %v1095_v60 }
 0x353   : > { %v1168_v6 = vsel %vm2253_vm1, %v1149_v3, %v1106_v63 }
 0x354   : > { %v1180_v8 = vpack.c.bf16 %v1168_v6, %v1167_v5  ;;  %v1166_v9 = vsel %vm2253_vm1, %v1147_v4, %v1098_v2 }
 0x355   : > { %v1179_v10 = vpack.c.bf16 %v1166_v9, %v1165_v7 }
 0x356   : > { %1193 = vst [vmem:[%s2266_s13 + $0x18] sm:$0xff] %v1180_v8 }
 0x357   : > { %1192 = vst [vmem:[%s2266_s13 + $0x10] sm:$0xff] %v1179_v10 }
 0x35c   : > { %v1574_v11 = vpop.f32.mrb[24].mxu1 }
 0x35d   : > { %v1119_v12 = vadd.f32 %v1574_v11, %v2247_v36  ;;  %v1110_v13 = vpop.f32.mrb[25].mxu1 }
 0x35e   : > { %v1111_v14 = vadd.f32 %v2247_v36, %v1110_v13  ;;  %v1575_v15 = vpop.f32.mrb[26].mxu1 }
 0x35f   : > { %v1152_v16 = vmax.f32 %v1119_v12, 0.0  ;;  %v1122_v17 = vadd.f32 %v1575_v15, %v2247_v36  ;;  %v1113_v18 = vpop.f32.mrb[27].mxu1 }
 0x360   : > { %v1150_v19 = vmax.f32 %v1111_v14, 0.0  ;;  %v1114_v20 = vadd.f32 %v2247_v36, %v1113_v18 }
 0x361   : > { %v1153_v21 = vmax.f32 %v1122_v17, 0.0  ;;  %v1171_v23 = vsel %vm2253_vm1, %v1152_v16, %v1119_v12 }
 0x362   : > { %v1151_v22 = vmax.f32 %v1114_v20, 0.0  ;;  %v1169_v25 = vsel %vm2253_vm1, %v1150_v19, %v1111_v14 }
 0x363   : > { %v1172_v24 = vsel %vm2253_vm1, %v1153_v21, %v1122_v17 }
 0x364   : > { %v1182_v26 = vpack.c.bf16 %v1172_v24, %v1171_v23  ;;  %v1170_v27 = vsel %vm2253_vm1, %v1151_v22, %v1114_v20 }
 0x365   : > { %v1181_v28 = vpack.c.bf16 %v1170_v27, %v1169_v25 }
 0x366   : > { %1195 = vst [vmem:[%s2266_s13 + $0x28] sm:$0xff] %v1182_v26 }
 0x367   : > { %1194 = vst [vmem:[%s2266_s13 + $0x20] sm:$0xff] %v1181_v28 }
 0x36c   : > { %v1578_v29 = vpop.f32.mrb[28].mxu1 }
 0x36d   : > { %v1135_v30 = vadd.f32 %v1578_v29, %v2247_v36  ;;  %v1126_v31 = vpop.f32.mrb[29].mxu1 }
 0x36e   : > { %v1127_v32 = vadd.f32 %v2247_v36, %v1126_v31  ;;  %v1579_v33 = vpop.f32.mrb[30].mxu1 }
 0x36f   : > { %v1156_v34 = vmax.f32 %v1135_v30, 0.0  ;;  %v1138_v35 = vadd.f32 %v1579_v33, %v2247_v36  ;;  %v1129_v37 = vpop.f32.mrb[31].mxu1 }
 0x370   : > { %v1154_v38 = vmax.f32 %v1127_v32, 0.0  ;;  %v1130_v39 = vadd.f32 %v2247_v36, %v1129_v37 }
 0x371   : > { %v1157_v40 = vmax.f32 %v1138_v35, 0.0  ;;  %v1175_v42 = vsel %vm2253_vm1, %v1156_v34, %v1135_v30  ;;  %1202 = sbr.rel (!%p1198_p0) target bundleno = 1141 (0x475), region = 109 }
 0x372   : > { %v1155_v41 = vmax.f32 %v1130_v39, 0.0  ;;  %v1173_v44 = vsel %vm2253_vm1, %v1154_v38, %v1127_v32 }
 0x373   : > { %v1176_v43 = vsel %vm2253_vm1, %v1157_v40, %v1138_v35 }
 0x374   : > { %v1184_v45 = vpack.c.bf16 %v1176_v43, %v1175_v42  ;;  %v1174_v47 = vsel %vm2253_vm1, %v1155_v41, %v1130_v39 }
 0x375   : > { %v1183_v48 = vpack.c.bf16 %v1174_v47, %v1173_v44 }
 0x376   : > { %1197 = vst [vmem:[%s2266_s13 + $0x38] sm:$0xff] %v1184_v45 }
 0x377   : > { %1196 = vst [vmem:[%s2266_s13 + $0x30] sm:$0xff] %v1183_v48 }
 0x37e   : > { %v1204_v36 = vld [vmem:[#allocation2 + $0x48] sm:$0xff]  ;;  %v1205_v50 = vld [vmem:[#allocation2 + $0x50] sm:$0xff]  ;;  %v1206_v51 = vld [vmem:[#allocation2 + $0x58] sm:$0xff] }
 0x37f   : > { %1581 = vmatpush3.bf16.msra.mxu0 %v1204_v36  ;;  %v1207_v46 = vld [vmem:[#allocation2 + $0x60] sm:$0xff]  ;;  %v1208_v52 = vld [vmem:[#allocation2 + $0x68] sm:$0xff]  ;;  %v1209_v53 = vld [vmem:[#allocation2 + $0x70] sm:$0xff] }
 0x380   : > { %1582 = vmatprep.subr.bf16.mxu0 %v1868_v49  ;;  %v1210_v54 = vld [vmem:[#allocation2 + $0x78] sm:$0xff]  ;;  %v1211_v55 = vld [vmem:[#allocation2 + $0x80] sm:$0xff] }
 0x383   : > { %1583 = vmatpush3.bf16.msra.mxu0 %v1205_v50 }
 0x384   : > { %1584 = vmatprep.subr.bf16.mxu0 %v1868_v49 }
 0x387   : > { %1585 = vmatpush3.bf16.msra.mxu0 %v1206_v51 }
 0x388   : > { %1586 = vmatprep.subr.bf16.mxu0 %v1868_v49 }
 0x38b   : > { %1587 = vmatpush3.bf16.msra.mxu0 %v1207_v46 }
 0x38c   : > { %1588 = vmatprep.subr.bf16.mxu0 %v1868_v49 }
 0x38f   : > { %1589 = vmatpush3.bf16.msra.mxu0 %v1208_v52 }
 0x390   : > { %1590 = vmatprep.subr.bf16.mxu0 %v1868_v49 }
 0x393   : > { %1591 = vmatpush3.bf16.msra.mxu0 %v1209_v53 }
 0x394   : > { %1592 = vmatprep.subr.bf16.mxu0 %v1868_v49 }
 0x397   : > { %1593 = vmatpush3.bf16.msra.mxu0 %v1210_v54 }
 0x398   : > { %1594 = vmatprep.subr.bf16.mxu0 %v1868_v49 }
 0x39b   : > { %1595 = vmatpush3.bf16.msra.mxu0 %v1211_v55 }
 0x39e   : > { %1597 = vmatmul.mubr.bf16.vlgmr.msra.gmra.mrb[0].mxu0 %v1212_v56 }
 0x471   : > { %v1247_v58 = vpop.f32.mrb[0].mxu0 }
 0x472   : > { %v1254_v59 = vmul.f32 %v1253_v57, %v1247_v58  ;;  %v1598_v60 = vpop.f32.mrb[1].mxu0 }
 0x473   : > { %v1250_v61 = vpop.f32.mrb[2].mxu0 }
 0x474   : > { %1255 = vst [vmem:[#allocation10] sm:$0xff] %v1254_v59  ;;  %v1599_v62 = vpop.f32.mrb[3].mxu0 }
 0x475 PF: > { %s2393_s25 = sadd.s32 4294967295, %s1860_s14   ;;  %s1870_s2 = smov [#allocation10]  }
 0x476   : > { %p2322_p7 = scmp.eq.s32.totalorder %s2393_s25, 2  ;;  %s1263_s5 = sshll.u32 %s1870_s2, 4  ;;  %s1264_s5 = int_to_ptr.vmem [resolvable:$true] %s1263_s5 }
 0x477   : > { %s1772_s24 = scalar_lea.vmem %s1264_s5, 128  ;;  %p1779_p8 = scmp.lt.s32.totalorder %s1264_s5, %s1264_s5 }
 0x478   : > { %p1773_p9 = scmp.ne.s32.totalorder %s1264_s5, %s1772_s24  ;;  %p1780_p1 = scmp.lt.s32.totalorder %s1772_s24, %s1772_s24 }
 0x47a   : > { %p1774_p11 = pnand %p1773_p9, %p2322_p7  ;;  %p1781_p2 = por %p1780_p1, %p1779_p8 }
 0x47c   : > { %p1775_p4 = pneg %p1774_p11 }
 0x47e   : > { %p1782_p13 = pnand %p1781_p2, %p1775_p4 }
 0x480   : > { %1785 = shalt.err (!%p1782_p13)
}
 0x481   : > { %s1786_s23 = scalar_lea.hbm %s2375_s9, 128 }
 0x482   : > { %p1787_p3 = scmp.ne.s32.totalorder %s2375_s9, %s1786_s23  ;;  %p1792_p10 = scmp.lt.u32.totalorder %s1786_s23, %s2375_s9 }
 0x484   : > { %p1788_p5 = pnand %p1787_p3, %p2322_p7 }
 0x486   : > { %p1789_p6 = pneg %p1788_p5 }
 0x488   : > { %p1794_p12 = pnand %p1792_p10, %p1789_p6 }
 0x48a   : > { %1797 = shalt.err (!%p1794_p12)
}
 0x48b   : > { %1605 = dma.vmem_to_hbm [thread:$0]  (%p2322_p7), %s1264_s5, 128, %s2375_s9, [#allocation7]  }
 0x48c   : > { %1835 = dma.done.wait (%p2322_p7), [#allocation7], 128  }
 0x48d   : > { %1837 = vsyncadd (%p2322_p7), [#allocation7], 4294967168 }
 0x48e PF: > { %s26_s14 = sadd.s32 1, %s1860_s14   ;;  %s2395_s12 = sld [smem:[#allocation21_spill]] }
 0x48f   : > { %p23_p0 = scmp.ge.s32.totalorder %s26_s14, 5   ;;  %s2396_s13 = sld [smem:[#allocation22_spill]] }
 0x490   : > { %s2397_s30 = smov %s1844_s10  ;;  %s2398_s10 = smov %s1848_s11 }
 0x491   : > { %s2399_s11 = smov %s1972_s21  ;;  %25 = sbr.rel (!%p23_p0) target bundleno = 10 (0xa), region = 181 }
 0x498   :  { %1276 = vsyncpa [#allocation6], 1 }
 0x499   :  { %1278 = vsyncpa [#allocation6 + $0x1], 1 }
 0x49a   :  { %1279 = vsyncpa [#allocation9], 1 }
 0x49b   :  { %1281 = vsyncpa [#allocation9 + $0x1], 1 }
 0x49c   :  { %1282 = vsyncpa [#allocation7], 1 }
 0x49d   :  { %1284 = vsyncpa [#allocation7 + $0x1], 1 }
 0x49e   :  { %1285 = vsyncmov [#allocation4] }
 0x4a1   :  { %s1286_s19 = vpop.sfrf %1285 }
 0x4a2   :  { %p1465_p7 = scmp.ne.s32.totalorder %s1286_s19, 0 }
 0x4a4   :  { %1290 = shalt.err (%p1465_p7)  }
 0x4a5   :  { %1292 = vsyncmov [#allocation4 + $0x1] }
 0x4a8   :  { %s1293_s22 = vpop.sfrf %1292 }
 0x4a9   :  { %p1466_p9 = scmp.ne.s32.totalorder %s1293_s22, 0 }
 0x4ab   :  { %1297 = shalt.err (%p1466_p9)  }

</bundles_post_ra>
